<compile_context>
chip_gen: v5e
topology: v5e:2x2
jax: 0.10.0
libtpu: 0.0.40
codegen_flags: <defaults>
</compile_context>

<pallas_src>
import jax
import jax.numpy as jnp
from jax.experimental import pallas as pl
from jax.experimental.pallas import tpu as pltpu


def _conv3x3_mm_kernel(w_ref, p_ref, o_ref):
    # w_ref: (Cout, K_p)  bf16 weight slab, K index = (kh*3 + kw)*Cin + ci
    # p_ref: (K_p, TH*W)  bf16 im2col patch tile (batch / row-block dims squeezed)
    # o_ref: (Cout, TH*W) f32 conv output tile (unpadded channels, lane-dense spatial)
    o_ref[...] = jnp.dot(w_ref[...], p_ref[...],
                         preferred_element_type=jnp.float32)


def _round_up(v, m):
    return (v + m - 1) // m * m


def _step_footprint(th, W, Cout, K_p):
    """Approximate per-grid-step VMEM footprint in bytes."""
    m = th * W
    return (2 * K_p * m * 2        # double-buffered bf16 patch tile
            + 2 * Cout * m * 4     # double-buffered f32 output tile
            + 2 * Cout * K_p * 2   # weight slab (counted double-buffered)
            + Cout * m * 4)        # matmul accumulator temporary


def _vmem_budgets():
    """(per-step tile budget, vmem_limit cap), generation aware with a safe fallback."""
    phys = 64 * 1024 * 1024            # conservative fallback = v7x (smallest VMEM)
    try:
        info = pltpu.get_tpu_info()
        phys = int(getattr(info, "vmem_capacity_bytes", phys)) or phys
    except Exception:
        pass
    tile_budget = min(24 * 1024 * 1024, phys // 4)          # 16 MiB on v7x, 24 MiB on v5e/v6e
    vmem_cap = min(96 * 1024 * 1024, (phys * 3) // 4)       # 48 MiB on v7x, 96 MiB on v5e/v6e
    return tile_budget, vmem_cap


def _pick_row_tile(N, H, W, Cout, K_p, budget_bytes):
    """Largest row tile TH dividing H with lane-dense (TH*W % 128 == 0) blocks that fits VMEM."""
    cands = [th for th in range(1, H + 1)
             if H % th == 0 and (th * W) % 128 == 0
             and _step_footprint(th, W, Cout, K_p) <= budget_bytes]
    if not cands:
        return H                      # single full-size block: block dims == array dims (always legal)
    if N % 2 == 1:
        # keep both v7x TensorCores busy at odd/small batch: prefer an even block count
        even = [th for th in cands if (H // th) % 2 == 0]
        if even:
            return max(even)
    return max(cands)


def upsample_forward(x_nchw, w_oihw, r=2):
    """Upsample forward. x: (N, n_feat, H, W) f32; w: (2*n_feat, n_feat, 3, 3) f32 (OIHW)."""
    N, Cin, H, W = x_nchw.shape
    Cout = w_oihw.shape[0]
    assert Cout % (r * r) == 0
    C = Cout // (r * r)

    K = 9 * Cin
    K_p = _round_up(K, 16)            # bf16 sublane pack; zero-padded K rows contribute nothing

    tile_budget, vmem_cap = _vmem_budgets()
    TH = _pick_row_tile(N, H, W, Cout, K_p, tile_budget)
    num_h = H // TH
    TM = TH * W

    # ---- wrapper-side im2col: one XLA pass over the (small) input, bf16 ----
    xb = x_nchw.astype(jnp.bfloat16)
    x_pad = jnp.pad(xb, ((0, 0), (0, 0), (1, 1), (1, 1)))
    taps = [x_pad[:, :, kh:kh + H, kw:kw + W] for kh in range(3) for kw in range(3)]
    patch = jnp.concatenate(taps, axis=1)                  # (N, 9*Cin, H, W); K idx = (kh*3+kw)*Cin+ci
    if K_p > K:
        patch = jnp.pad(patch, ((0, 0), (0, K_p - K), (0, 0), (0, 0)))
    patch = patch.reshape(N, K_p, H * W)                   # spatial flattened row-major -> lane dim

    # weight OIHW -> (Cout, K_p) with the same K ordering
    w2d = jnp.transpose(w_oihw, (0, 2, 3, 1)).reshape(Cout, K).astype(jnp.bfloat16)
    if K_p > K:
        w2d = jnp.pad(w2d, ((0, 0), (0, K_p - K)))

    fp = _step_footprint(TH, W, Cout, K_p)
    vmem_limit = int(min(vmem_cap, max(16 * 1024 * 1024, 4 * fp)))

    conv = pl.pallas_call(
        _conv3x3_mm_kernel,
        out_shape=jax.ShapeDtypeStruct((N, Cout, H * W), jnp.float32),
        grid_spec=pltpu.PrefetchScalarGridSpec(
            num_scalar_prefetch=0,
            grid=(N, num_h),
            in_specs=[
                pl.BlockSpec((Cout, K_p), lambda n, h: (0, 0)),
                pl.BlockSpec((pl.Squeezed(), K_p, TM), lambda n, h: (n, 0, h)),
            ],
            out_specs=pl.BlockSpec((pl.Squeezed(), Cout, TM), lambda n, h: (n, 0, h)),
        ),
        compiler_params=pltpu.CompilerParams(
            dimension_semantics=("parallel", "parallel"),
            vmem_limit_bytes=vmem_limit),
    )(w2d, patch)                                          # (N, Cout, H*W) f32, unpadded channels

    y = conv.reshape(N, Cout, H, W)                        # free metadata reshape
    # PixelShuffle(r): out[n, c, r*h+i, r*w+j] = y[n, c*r*r + i*r + j, h, w]
    y = y.reshape(N, C, r, r, H, W)
    y = jnp.transpose(y, (0, 1, 4, 2, 5, 3))
    return y.reshape(N, C, H * r, W * r)


# ---------------------------------------------------------------------------
# Reference (pure JAX) for correctness checking.
# ---------------------------------------------------------------------------
def _pixel_shuffle_nchw(y, r):
    N, Cr2, H, W = y.shape
    C = Cr2 // (r * r)
    y = y.reshape(N, C, r, r, H, W)
    y = jnp.transpose(y, (0, 1, 4, 2, 5, 3))
    return y.reshape(N, C, H * r, W * r)


def _reference_forward(x_nchw, w_oihw):
    # Same bf16 quantization of x/w as the kernel (intentional perf choice); the conv
    # itself is accumulated in f32 at highest precision.
    xb = x_nchw.astype(jnp.bfloat16).astype(jnp.float32)
    wb = w_oihw.astype(jnp.bfloat16).astype(jnp.float32)
    y = jax.lax.conv_general_dilated(
        xb, wb, window_strides=(1, 1), padding=((1, 1), (1, 1)),
        dimension_numbers=("NCHW", "OIHW", "NCHW"),
        precision=jax.lax.Precision.HIGHEST)
    return _pixel_shuffle_nchw(y, 2)


if __name__ == "__main__":
    key = jax.random.PRNGKey(0)
    k_x, k_w = jax.random.split(key)

    n_feat = 4
    N, H, W = 2, 16, 16
    x = jax.random.normal(k_x, (N, n_feat, H, W), dtype=jnp.float32)
    # Conv2d(n_feat, 2*n_feat, 3) weight, OIHW, no bias; deterministic init.
    w = jax.random.normal(k_w, (2 * n_feat, n_feat, 3, 3), dtype=jnp.float32) * 0.1

    fwd = jax.jit(upsample_forward)
    out = jax.block_until_ready(fwd(x, w))
    ref = jax.block_until_ready(_reference_forward(x, w))

    assert out.shape == (N, n_feat // 2, 2 * H, 2 * W), out.shape
    max_err = float(jnp.max(jnp.abs(out - ref)))
    assert jnp.allclose(out, ref, atol=2e-3, rtol=2e-3), \
        f"mismatch vs reference, max abs err {max_err}"
    print("KERNEL_OK")
</pallas_src>

<mosaic_0001>
module attributes {stable_mosaic.version = 11 : i64} {
  func.func @_conv3x3_mm_kernel(%arg0: i32, %arg1: i32, %arg2: memref<8x48xbf16, #tpu.memory_space<vmem>>, %arg3: memref<1x48x256xbf16, #tpu.memory_space<vmem>>, %arg4: memref<1x8x256xf32, #tpu.memory_space<vmem>>) attributes {dimension_semantics = [#tpu.dimension_semantics<parallel>, #tpu.dimension_semantics<parallel>], iteration_bounds = array<i64: 2, 1>, scalar_prefetch = 0 : i64, scratch_operands = 0 : i64, tpu.core_type = #tpu.core_type<tc>, window_params = [{pipeline_mode = #tpu.pipeline_mode<synchronous>, transform_indices = @transform_0, window_bounds = array<i64: 8, 48>}, {transform_indices = @transform_1, window_bounds = array<i64: 1, 48, 256>}, {transform_indices = @transform_2, window_bounds = array<i64: 1, 8, 256>}]} {
    %c0 = arith.constant 0 : index
    %c0_0 = arith.constant 0 : index
    %0 = vector.load %arg2[%c0, %c0_0] : memref<8x48xbf16, #tpu.memory_space<vmem>>, vector<8x48xbf16>
    %c0_1 = arith.constant 0 : index
    %c0_2 = arith.constant 0 : index
    %c0_3 = arith.constant 0 : index
    %1 = vector.load %arg3[%c0_1, %c0_2, %c0_3] : memref<1x48x256xbf16, #tpu.memory_space<vmem>>, vector<1x48x256xbf16>
    %2 = vector.shape_cast %1 : vector<1x48x256xbf16> to vector<48x256xbf16>
    %cst = arith.constant dense<0.000000e+00> : vector<8x256xf32>
    %3 = tpu.matmul %0, %2, %cst {dimension_numbers = #tpu.dot_dimension_numbers<[1], [0], [0], [1], [0, 0, 1, 1], [], []>} : vector<8x48xbf16>, vector<48x256xbf16>, vector<8x256xf32> -> vector<8x256xf32>
    %c0_4 = arith.constant 0 : index
    %c0_5 = arith.constant 0 : index
    %c0_6 = arith.constant 0 : index
    %4 = vector.load %arg4[%c0_4, %c0_5, %c0_6] : memref<1x8x256xf32, #tpu.memory_space<vmem>>, vector<1x8x256xf32>
    %5 = vector.shape_cast %4 : vector<1x8x256xf32> to vector<8x256xf32>
    %6 = vector.shape_cast %3 : vector<8x256xf32> to vector<1x8x256xf32>
    tpu.vector_store %arg4[%c0_4, %c0_5, %c0_6], %6 {strides = array<i32>} : memref<1x8x256xf32, #tpu.memory_space<vmem>>, vector<1x8x256xf32>,
    return
  }
  func.func @transform_0(%arg0: i32, %arg1: i32) -> (i32, i32) {
    %c0_i32 = arith.constant 0 : i32
    %c0_i32_0 = arith.constant 0 : i32
    %c0_i32_1 = arith.constant 0 : i32
    return %c0_i32, %c0_i32_0 : i32, i32
  }
  func.func @transform_1(%arg0: i32, %arg1: i32) -> (i32, i32, i32) {
    %c0_i32 = arith.constant 0 : i32
    %c0_i32_0 = arith.constant 0 : i32
    return %arg0, %c0_i32, %arg1 : i32, i32, i32
  }
  func.func @transform_2(%arg0: i32, %arg1: i32) -> (i32, i32, i32) {
    %c0_i32 = arith.constant 0 : i32
    %c0_i32_0 = arith.constant 0 : i32
    return %arg0, %c0_i32, %arg1 : i32, i32, i32
  }
}

</mosaic_0001>

<bundles_post_ra>
// kernel: upsample_forward.1
= control target key start
LH: loop header
LB: loop body
LE: loop exit
PB: predicated region body
PF: predicated region fallthrough
CT: control target
= control target key end

     0   :  { %s447_s9 = smov 0   ;;  %s449_s10 = smov 0   ;;  %s487_s0 = inlined_call_operand.vmem [shape: bf16[8,48], index: 0, kind: input, shape index: {}]   ;;  %s488_s1 = inlined_call_operand.vmem [shape: bf16[2,48,256], index: 1, kind: input, shape index: {}]   ;;  %s489_s2 = inlined_call_operand.vmem [shape: f32[2,8,256], index: 2, kind: output, shape index: {}]  }
   0x1   :  { %s451_s11 = smov 0  }
   0x2 LB: > { %s24_s12 = sadd.s32 1, %s426_s10  ;;  %p344_p0 = scmp.ge.s32.totalorder %s430_s11, 1  ;;  %s430_s11 = sphi %s451_s11, %s12_s11   ;;  %s426_s10 = sphi %s449_s10, %s491_s10   ;;  %s422_s9 = sphi %s447_s9, %s490_s9  }
   0x3   : > { %p26_p1 = scmp.ge.s32.totalorder %s24_s12, 2  ;;  %p133_p2 = scmp.lt.s32.totalorder %s430_s11, 3 }
   0x5   : > { %s493_s12 = smov (%p26_p1, %s24_s12), 0  ;;  %p134_p3 = pnand %p344_p0, %p133_p2 }
   0x6   : > { %p164_p4 = scmp.lt.s32.totalorder (!%p134_p3), %s422_s9, 1 }
   0x7   : > { %137 = sbr.rel (%p134_p3) target bundleno = 165 (0xa5), region = 28 }
   0xc   : > { %s495_s9 = smov (!%p164_p4, %s422_s9), 1  ;;  %v184_v18 = vld [vmem:[%s487_s0] sm:$0xf]  ;;  %vm221_vm0 = vcmask 392192  }
   0xd   : > { %s383_s13 = smul.u32 48, %s495_s9  ;;  %s376_s19 = sshll.u32 %s495_s9, 4 }
   0xe   : > { %s181_s22 = scalar_lea.vmem %s489_s2, %s376_s19 }
   0xf   : > { %s171_s16 = scalar_lea.vmem %s488_s1, %s383_s13 }
  0x10   : > { %v366_v0 = vld [vmem:[%s171_s16 + $0x20] sm:$0xf]  ;;  %v382_v1 = vld [vmem:[%s171_s16 + $0x24] sm:$0xf0]  ;;  %v381_v2 = vld [vmem:[%s171_s16 + $0x24] sm:$0xf] }
  0x11   : > { %v367_v3 = vor.u32 %v382_v1, %v366_v0  ;;  %v368_v4 = vld [vmem:[%s171_s16 + $0x28] sm:$0xf0]  ;;  %v358_v5 = vld [vmem:[%s171_s16 + $0x10] sm:$0xf]  ;;  %v380_v6 = vld [vmem:[%s171_s16 + $0x14] sm:$0xf0] }
  0x12   : > { %v371_v7 = vor.u32 %v381_v2, %v368_v4  ;;  %v379_v8 = vld [vmem:[%s171_s16 + $0x14] sm:$0xf]  ;;  %v360_v9 = vld [vmem:[%s171_s16 + $0x18] sm:$0xf0]  ;;  %v359_v10 = vor.u32 %v380_v6, %v358_v5  ;;  %v350_v12 = vld [vmem:[%s171_s16] sm:$0xf] }
  0x13   : > { %230 = vmatpush.bf16.msra.mxu0 %v367_v3  ;;  %v363_v11 = vor.u32 %v379_v8, %v360_v9  ;;  %v378_v13 = vld [vmem:[%s171_s16 + $0x4] sm:$0xf0]  ;;  %v377_v14 = vld [vmem:[%s171_s16 + $0x4] sm:$0xf]  ;;  %v352_v15 = vld [vmem:[%s171_s16 + $0x8] sm:$0xf0] }
  0x14   : > { %243 = vmatpush.bf16.msra.mxu1 %v371_v7  ;;  %v351_v16 = vor.u32 %v378_v13, %v350_v12  ;;  %v355_v17 = vor.u32 %v377_v14, %v352_v15 }
  0x17   : > { %231 = vmatpush.bf16.msra.mxu0 %v359_v10 }
  0x18   : > { %244 = vmatpush.bf16.msra.mxu1 %v363_v11 }
  0x1b   : > { %232 = vmatpush.bf16.msra.mxu0 %v351_v16 }
  0x1c   : > { %245 = vmatpush.bf16.msra.mxu1 %v355_v17 }
  0x1e   : > { %372 = vmatmul.msk.bf16.vlgmr.msra.gmra.mxu0 %vm221_vm0, %v184_v18 }
  0x1f   : > { %373 = vmatmul.msk.bf16.vlgmr.msra.gmra.mxu1 %vm221_vm0, %v184_v18 }
  0x9b   : > { %v234_v19 = vpop.f32.mrf.mxu0 }
  0x9c   : > { %251 = vst [vmem:[%s181_s22] sm:$0xff] %v234_v19  ;;  %v247_v20 = vpop.f32.mrf.mxu1 }
  0x9d   : > { %252 = vst [vmem:[%s181_s22 + $0x8] sm:$0xff] %v247_v20 }
  0xa3   : > { %v236_v21 = vpop.f32.mrf.mxu0 }
  0xa4   : > { %v249_v22 = vpop.f32.mrf.mxu1 }
  0xa5 PF: > { %s12_s11 = sadd.s32 1, %s430_s11   ;;  %s490_s9 = smov %s426_s10 }
  0xa6   : > { %p9_p5 = scmp.ge.s32.totalorder %s12_s11, 4   ;;  %s491_s10 = smov %s493_s12 }
  0xa8   :  { %11 = sbr.rel (!%p9_p5) target bundleno = 2 (0x2), region = 58 }

</bundles_post_ra>
